<compile_context>
chip_gen: v5e
topology: v5e:2x2
jax: 0.10.0
libtpu: 0.0.40
codegen_flags: <defaults>
</compile_context>

<pallas_src>
import functools

import jax
import jax.numpy as jnp
from jax.experimental import pallas as pl
from jax.experimental.pallas import tpu as pltpu


def _mlp_kernel(alpha_ref, x_ref, w1_ref, b1_ref, w2_ref, b2_ref, o_ref, acc_ref):
    # alpha_ref: (1,) f32 in SMEM (PReLU slope)
    # x_ref:  (tm, H)    w1_ref: (H, ti)   b1_ref: (1, ti)
    # w2_ref: (ti, H)    b2_ref: (1, H)    o_ref:  (tm, H)   acc_ref: (tm, H) f32
    k = pl.program_id(1)

    @pl.when(k == 0)
    def _():
        acc_ref[...] = jnp.zeros_like(acc_ref)

    # First matmul: (tm, H) @ (H, ti) -> f32; bias add + PReLU stay in f32.
    h = jnp.dot(x_ref[...], w1_ref[...], preferred_element_type=jnp.float32)
    h = h + b1_ref[...]
    alpha = alpha_ref[0]
    h = jnp.where(h > 0, h, alpha * h)          # PReLU (num_parameters=1)

    # Second matmul: (tm, ti) @ (ti, H), accumulated in f32 across I-chunks.
    acc_ref[...] += jnp.dot(h.astype(w2_ref.dtype), w2_ref[...],
                            preferred_element_type=jnp.float32)

    @pl.when(k == pl.num_programs(1) - 1)
    def _():
        # TODO(synk): nn.Dropout is a training-time op; forward here is inference
        # (identity), matching model.eval().
        o_ref[...] = (acc_ref[...] + b2_ref[...]).astype(o_ref.dtype)


def _round_up(a, b):
    return (a + b - 1) // b * b


def _default_vmem_limit_bytes():
    try:
        cap = pltpu.get_tpu_info().vmem_capacity_bytes
    except Exception:
        cap = 128 * 1024 * 1024
    return int(cap * 3 // 4)


@functools.partial(jax.jit, static_argnames=("tm", "ti", "compute_dtype"))
def gpt2_mlp_lc(x, w_fc, b_fc, w_proj, b_proj, alpha, *,
                tm=256, ti=1024, compute_dtype=jnp.bfloat16):
    """GPT2MLPLC forward.  x: (B, S, H) -> (B, S, H) in x.dtype."""
    assert tm % 8 == 0 and ti % 128 == 0
    B, S, H = x.shape
    I = w_fc.shape[1]
    M = B * S

    # Row tile: as large as requested but no larger than (padded) M; mult. of 8.
    tm_eff = min(tm, _round_up(M, 8))
    M_pad = _round_up(M, tm_eff)
    # Intermediate-dim chunk: multiple of 128; a single chunk if I fits.
    ti_eff = min(ti, _round_up(I, 128))
    I_pad = _round_up(I, ti_eff)
    nm = M_pad // tm_eff
    nk = I_pad // ti_eff

    out_dtype = x.dtype

    x2 = x.reshape(M, H)
    if M_pad != M:
        x2 = jnp.pad(x2, ((0, M_pad - M), (0, 0)))
    # Zero padding along I is exact: padded h columns are PReLU(0) = 0 and the
    # matching zero rows of W_proj contribute nothing.
    w1, b1, w2 = w_fc, b_fc, w_proj
    if I_pad != I:
        w1 = jnp.pad(w1, ((0, 0), (0, I_pad - I)))
        b1 = jnp.pad(b1, ((0, I_pad - I),))
        w2 = jnp.pad(w2, ((0, I_pad - I), (0, 0)))

    # MXU inputs in compute_dtype (bf16 by default); biases/PReLU/acc stay f32.
    x2 = x2.astype(compute_dtype)
    w1 = w1.astype(compute_dtype)
    w2 = w2.astype(compute_dtype)
    b1 = b1.reshape(1, I_pad).astype(jnp.float32)
    b2 = b_proj.reshape(1, H).astype(jnp.float32)
    alpha = alpha.reshape(1).astype(jnp.float32)

    # Single-buffer BlockSpecs whose block never changes across the grid.
    def _spec(shape, index_map, constant):
        if constant:
            return pl.BlockSpec(shape, index_map, pipeline_mode=pl.Buffered(1))
        return pl.BlockSpec(shape, index_map)

    weights_constant = (nk == 1)

    bytes_el = jnp.dtype(compute_dtype).itemsize
    cost = pl.CostEstimate(
        flops=4 * M_pad * H * I_pad,
        transcendentals=0,
        bytes_accessed=(M_pad * H * bytes_el                 # x
                        + 2 * H * I_pad * bytes_el           # W_fc, W_proj
                        + (I_pad + H) * 4                    # biases
                        + M_pad * H * jnp.dtype(out_dtype).itemsize))

    out = pl.pallas_call(
        _mlp_kernel,
        out_shape=jax.ShapeDtypeStruct((M_pad, H), out_dtype),
        grid_spec=pltpu.PrefetchScalarGridSpec(
            num_scalar_prefetch=0,
            grid=(nm, nk),
            in_specs=[
                pl.BlockSpec(memory_space=pltpu.MemorySpace.SMEM),           # alpha
                pl.BlockSpec((tm_eff, H), lambda i, k: (i, 0)),              # x rows
                _spec((H, ti_eff), lambda i, k: (0, k), weights_constant),   # W_fc
                _spec((1, ti_eff), lambda i, k: (0, k), weights_constant),   # b_fc
                _spec((ti_eff, H), lambda i, k: (k, 0), weights_constant),   # W_proj
                _spec((1, H), lambda i, k: (0, 0), True),                    # b_proj
            ],
            out_specs=pl.BlockSpec((tm_eff, H), lambda i, k: (i, 0)),
            scratch_shapes=[pltpu.VMEM((tm_eff, H), jnp.float32)],
        ),
        compiler_params=pltpu.CompilerParams(
            dimension_semantics=("parallel", "arbitrary"),
            vmem_limit_bytes=_default_vmem_limit_bytes()),
        cost_estimate=cost,
    )(alpha, x2, w1, b1, w2, b2)

    return out[:M].reshape(B, S, H)


def _reference(x, w_fc, b_fc, w_proj, b_proj, alpha):
    h = jnp.einsum("bsh,hi->bsi", x, w_fc) + b_fc
    h = jnp.where(h > 0, h, alpha.reshape(()) * h)
    return jnp.einsum("bsi,ih->bsh", h, w_proj) + b_proj


if __name__ == "__main__":
    def make_params(key, B, S, H, I):
        kx, kw1, kw2 = jax.random.split(key, 3)
        x = jax.random.normal(kx, (B, S, H), dtype=jnp.float32)
        # Conv1D init: weight ~ N(0, 0.02), bias = 0; PReLU alpha = 0.01.
        w_fc = 0.02 * jax.random.normal(kw1, (H, I), dtype=jnp.float32)
        b_fc = jnp.zeros((I,), jnp.float32)
        w_proj = 0.02 * jax.random.normal(kw2, (I, H), dtype=jnp.float32)
        b_proj = jnp.zeros((H,), jnp.float32)
        alpha = jnp.full((1,), 0.01, dtype=jnp.float32)
        return x, w_fc, b_fc, w_proj, b_proj, alpha

    # 1) Toy GPT-2 shapes (batch=2, seq=8, hidden=32, intermediate=4*hidden),
    #    exact f32 path.
    args = make_params(jax.random.PRNGKey(0), 2, 8, 32, 128)
    out = jax.block_until_ready(gpt2_mlp_lc(*args, compute_dtype=jnp.float32))
    ref = _reference(*args)
    assert out.shape == ref.shape
    assert jnp.allclose(out, ref, atol=1e-5, rtol=1e-5), "f32 mismatch vs reference"

    # 2) Same shapes, default bf16 MXU inputs with f32 accumulation (looser tol).
    out_bf16 = jax.block_until_ready(gpt2_mlp_lc(*args))
    assert jnp.allclose(out_bf16, ref, atol=2e-2, rtol=2e-2), "bf16 mismatch"

    # 3) Exercise the I-chunked accumulator path (nk=2) and M padding (10 -> 16).
    args3 = make_params(jax.random.PRNGKey(1), 1, 10, 32, 256)
    out3 = jax.block_until_ready(
        gpt2_mlp_lc(*args3, ti=128, compute_dtype=jnp.float32))
    ref3 = _reference(*args3)
    assert jnp.allclose(out3, ref3, atol=1e-5, rtol=1e-5), "chunked-I mismatch"

    print("KERNEL_OK")
</pallas_src>

<mosaic_0001>
module attributes {stable_mosaic.version = 11 : i64} {
  func.func @_mlp_kernel(%arg0: i32, %arg1: i32, %arg2: memref<1xf32, #tpu.memory_space<smem>>, %arg3: memref<16x32xf32, #tpu.memory_space<vmem>>, %arg4: memref<32x128xf32, #tpu.memory_space<vmem>>, %arg5: memref<1x128xf32, #tpu.memory_space<vmem>>, %arg6: memref<128x32xf32, #tpu.memory_space<vmem>>, %arg7: memref<1x32xf32, #tpu.memory_space<vmem>>, %arg8: memref<16x32xf32, #tpu.memory_space<vmem>>, %arg9: memref<16x32xf32, #tpu.memory_space<vmem>>) attributes {dimension_semantics = [#tpu.dimension_semantics<parallel>, #tpu.dimension_semantics<arbitrary>], iteration_bounds = array<i64: 1, 1>, scalar_prefetch = 0 : i64, scratch_operands = 1 : i64, tpu.core_type = #tpu.core_type<tc>, window_params = [{transform_indices = @transform_0, window_bounds = array<i64: 1>}, {transform_indices = @transform_1, window_bounds = array<i64: 16, 32>}, {pipeline_mode = #tpu.pipeline_mode<synchronous>, transform_indices = @transform_2, window_bounds = array<i64: 32, 128>}, {pipeline_mode = #tpu.pipeline_mode<synchronous>, transform_indices = @transform_3, window_bounds = array<i64: 1, 128>}, {pipeline_mode = #tpu.pipeline_mode<synchronous>, transform_indices = @transform_4, window_bounds = array<i64: 128, 32>}, {pipeline_mode = #tpu.pipeline_mode<synchronous>, transform_indices = @transform_5, window_bounds = array<i64: 1, 32>}, {transform_indices = @transform_6, window_bounds = array<i64: 16, 32>}]} {
    %c0_i32 = arith.constant 0 : i32
    %0 = arith.cmpi eq, %arg1, %c0_i32 : i32
    %1 = arith.extui %0 : i1 to i32
    %c0_i32_0 = arith.constant 0 : i32
    %2 = arith.cmpi ne, %1, %c0_i32_0 : i32
    scf.if %2 {
      %cst_17 = arith.constant 0.000000e+00 : f32
      %23 = vector.broadcast %cst_17 : f32 to vector<16x32xf32>
      %c0_18 = arith.constant 0 : index
      %c0_19 = arith.constant 0 : index
      %24 = vector.load %arg9[%c0_18, %c0_19] : memref<16x32xf32, #tpu.memory_space<vmem>>, vector<16x32xf32>
      tpu.vector_store %arg9[%c0_18, %c0_19], %23 {strides = array<i32>} : memref<16x32xf32, #tpu.memory_space<vmem>>, vector<16x32xf32>,
    } else {
    }
    %c0 = arith.constant 0 : index
    %c0_1 = arith.constant 0 : index
    %3 = vector.load %arg3[%c0, %c0_1] : memref<16x32xf32, #tpu.memory_space<vmem>>, vector<16x32xf32>
    %c0_2 = arith.constant 0 : index
    %c0_3 = arith.constant 0 : index
    %4 = vector.load %arg4[%c0_2, %c0_3] : memref<32x128xf32, #tpu.memory_space<vmem>>, vector<32x128xf32>
    %cst = arith.constant dense<0.000000e+00> : vector<16x128xf32>
    %5 = tpu.matmul %3, %4, %cst {dimension_numbers = #tpu.dot_dimension_numbers<[1], [0], [0], [1], [0, 0, 1, 1], [], []>} : vector<16x32xf32>, vector<32x128xf32>, vector<16x128xf32> -> vector<16x128xf32>
    %c0_4 = arith.constant 0 : index
    %c0_5 = arith.constant 0 : index
    %6 = vector.load %arg5[%c0_4, %c0_5] : memref<1x128xf32, #tpu.memory_space<vmem>>, vector<1x128xf32>
    %7 = vector.broadcast %6 : vector<1x128xf32> to vector<16x128xf32>
    %8 = arith.addf %5, %7 : vector<16x128xf32>
    %c0_6 = arith.constant 0 : index
    %9 = memref.load %arg2[%c0_6] : memref<1xf32, #tpu.memory_space<smem>>
    %cst_7 = arith.constant 0.000000e+00 : f32
    %10 = vector.broadcast %cst_7 : f32 to vector<16x128xf32>
    %11 = arith.cmpf ogt, %8, %10 : vector<16x128xf32>
    %12 = vector.broadcast %9 : f32 to vector<16x128xf32>
    %13 = arith.mulf %12, %8 : vector<16x128xf32>
    %14 = arith.select %11, %8, %13 : vector<16x128xi1>, vector<16x128xf32>
    %c0_8 = arith.constant 0 : index
    %c0_9 = arith.constant 0 : index
    %15 = vector.load %arg9[%c0_8, %c0_9] : memref<16x32xf32, #tpu.memory_space<vmem>>, vector<16x32xf32>
    %c0_10 = arith.constant 0 : index
    %c0_11 = arith.constant 0 : index
    %16 = vector.load %arg6[%c0_10, %c0_11] : memref<128x32xf32, #tpu.memory_space<vmem>>, vector<128x32xf32>
    %cst_12 = arith.constant dense<0.000000e+00> : vector<16x32xf32>
    %17 = tpu.matmul %14, %16, %cst_12 {dimension_numbers = #tpu.dot_dimension_numbers<[1], [0], [0], [1], [0, 0, 1, 1], [], []>} : vector<16x128xf32>, vector<128x32xf32>, vector<16x32xf32> -> vector<16x32xf32>
    %18 = arith.addf %15, %17 : vector<16x32xf32>
    %c0_13 = arith.constant 0 : index
    %c0_14 = arith.constant 0 : index
    %19 = vector.load %arg9[%c0_13, %c0_14] : memref<16x32xf32, #tpu.memory_space<vmem>>, vector<16x32xf32>
    tpu.vector_store %arg9[%c0_13, %c0_14], %18 {strides = array<i32>} : memref<16x32xf32, #tpu.memory_space<vmem>>, vector<16x32xf32>,
    %c0_i32_15 = arith.constant 0 : i32
    %20 = arith.cmpi eq, %arg1, %c0_i32_15 : i32
    %21 = arith.extui %20 : i1 to i32
    %c0_i32_16 = arith.constant 0 : i32
    %22 = arith.cmpi ne, %21, %c0_i32_16 : i32
    scf.if %22 {
      %c0_17 = arith.constant 0 : index
      %c0_18 = arith.constant 0 : index
      %23 = vector.load %arg9[%c0_17, %c0_18] : memref<16x32xf32, #tpu.memory_space<vmem>>, vector<16x32xf32>
      %c0_19 = arith.constant 0 : index
      %c0_20 = arith.constant 0 : index
      %24 = vector.load %arg7[%c0_19, %c0_20] : memref<1x32xf32, #tpu.memory_space<vmem>>, vector<1x32xf32>
      %25 = vector.broadcast %24 : vector<1x32xf32> to vector<16x32xf32>
      %26 = arith.addf %23, %25 : vector<16x32xf32>
      %c0_21 = arith.constant 0 : index
      %c0_22 = arith.constant 0 : index
      %27 = vector.load %arg8[%c0_21, %c0_22] : memref<16x32xf32, #tpu.memory_space<vmem>>, vector<16x32xf32>
      tpu.vector_store %arg8[%c0_21, %c0_22], %26 {strides = array<i32>} : memref<16x32xf32, #tpu.memory_space<vmem>>, vector<16x32xf32>,
    } else {
    }
    return
  }
  func.func @transform_0(%arg0: i32, %arg1: i32) -> i32 {
    %c0_i32 = arith.constant 0 : i32
    %c0_i32_0 = arith.constant 0 : i32
    return %c0_i32 : i32
  }
  func.func @transform_1(%arg0: i32, %arg1: i32) -> (i32, i32) {
    %c0_i32 = arith.constant 0 : i32
    %c0_i32_0 = arith.constant 0 : i32
    return %arg0, %c0_i32 : i32, i32
  }
  func.func @transform_2(%arg0: i32, %arg1: i32) -> (i32, i32) {
    %c0_i32 = arith.constant 0 : i32
    %c0_i32_0 = arith.constant 0 : i32
    return %c0_i32, %arg1 : i32, i32
  }
  func.func @transform_3(%arg0: i32, %arg1: i32) -> (i32, i32) {
    %c0_i32 = arith.constant 0 : i32
    %c0_i32_0 = arith.constant 0 : i32
    return %c0_i32, %arg1 : i32, i32
  }
  func.func @transform_4(%arg0: i32, %arg1: i32) -> (i32, i32) {
    %c0_i32 = arith.constant 0 : i32
    %c0_i32_0 = arith.constant 0 : i32
    return %arg1, %c0_i32 : i32, i32
  }
  func.func @transform_5(%arg0: i32, %arg1: i32) -> (i32, i32) {
    %c0_i32 = arith.constant 0 : i32
    %c0_i32_0 = arith.constant 0 : i32
    %c0_i32_1 = arith.constant 0 : i32
    return %c0_i32, %c0_i32_0 : i32, i32
  }
  func.func @transform_6(%arg0: i32, %arg1: i32) -> (i32, i32) {
    %c0_i32 = arith.constant 0 : i32
    %c0_i32_0 = arith.constant 0 : i32
    return %arg0, %c0_i32 : i32, i32
  }
}

</mosaic_0001>

<bundles_post_ra>
// kernel: gpt2_mlp_lc.1
= control target key start
LH: loop header
LB: loop body
LE: loop exit
PB: predicated region body
PF: predicated region fallthrough
CT: control target
= control target key end

     0   :  { %vm29_vm0 = vcmask 261120   ;;  %s331_s0 = inlined_call_operand.<no memory space> [shape: f32[1], index: 0, kind: input, shape index: {}]   ;;  %s332_s1 = inlined_call_operand.vmem [shape: f32[16,32], index: 1, kind: input, shape index: {}]   ;;  %s333_s2 = inlined_call_operand.vmem [shape: f32[32,128], index: 2, kind: input, shape index: {}]   ;;  %s334_s3 = inlined_call_operand.vmem [shape: f32[1,128], index: 3, kind: input, shape index: {}]   ;;  %s335_s4 = inlined_call_operand.vmem [shape: f32[128,32], index: 4, kind: input, shape index: {}]   ;;  %s336_s5 = inlined_call_operand.vmem [shape: f32[1,32], index: 5, kind: input, shape index: {}]   ;;  %s337_s6 = inlined_call_operand.hbm [shape: f32[16,32], index: 6, kind: output, shape index: {}]  }
   0x1   :  { %v37_v0 = vld [vmem:[%s333_s2 + $0x18] sm:$0xff]  ;;  %v36_v1 = vld [vmem:[%s333_s2 + $0x10] sm:$0xff]  ;;  %v35_v2 = vld [vmem:[%s333_s2 + $0x8] sm:$0xff] }
   0x2   :  { %61 = vmatpush.msra.mxu0 %v37_v0  ;;  %v97_v3 = vld [vmem:[%s335_s4 + $0x78] sm:$0xff]  ;;  %v96_v4 = vld [vmem:[%s335_s4 + $0x70] sm:$0xff]  ;;  %v34_v5 = vld [vmem:[%s333_s2] sm:$0xff] }
   0x3   :  { %98 = vmatpush.msra.mxu1 %v97_v3  ;;  %v95_v6 = vld [vmem:[%s335_s4 + $0x68] sm:$0xff]  ;;  %158 = vmatpush.msra.mxu2 %v97_v3  ;;  %v32_v7 = vld [vmem:[%s332_s1] sm:$0xff] }
   0x4   :  { %62 = vmatpush.msra.mxu0 %v36_v1  ;;  %v94_v8 = vld [vmem:[%s335_s4 + $0x60] sm:$0xff] }
   0x5   :  { %99 = vmatpush.msra.mxu1 %v96_v4  ;;  %159 = vmatpush.msra.mxu2 %v96_v4 }
   0x6   :  { %63 = vmatpush.msra.mxu0 %v35_v2 }
   0x7   :  { %100 = vmatpush.msra.mxu1 %v95_v6 }
   0x8   :  { %64 = vmatpush.msra.mxu0 %v34_v5 }
   0x9   :  { %12 = vsyncpa [#allocation5], 0  ;;  %156 = vmatmul.msk.f32.vlgmr.msra.gmra.mxu0 %vm29_vm0, %v32_v7  ;;  %v93_v9 = vld [vmem:[%s335_s4 + $0x58] sm:$0xff]  ;;  %160 = vmatpush.msra.mxu2 %v95_v6  ;;  %v92_v10 = vld [vmem:[%s335_s4 + $0x50] sm:$0xff]  ;;  %v206_v22 = vmov 0.0   ;;  %v75_v25 = vstv %s331_s0  ;;  %s207_s0 = smov [#allocation4]  }
   0xa   :  { %101 = vmatpush.msra.mxu1 %v94_v8  ;;  %v91_v11 = vld [vmem:[%s335_s4 + $0x48] sm:$0xff]  ;;  %v90_v13 = vld [vmem:[%s335_s4 + $0x40] sm:$0xff]  ;;  %v89_v14 = vld [vmem:[%s335_s4 + $0x38] sm:$0xff]  ;;  %30 = vst.msk [vmem:[#allocation2] sm:$0xff] %vm29_vm0, %v206_v22  ;;  %s142_s18 = sshll.u32 %s207_s0, 4  ;;  %s144_s21 = sshll.u32 %s337_s6, 4  ;;  %s143_s18 = int_to_ptr.vmem [resolvable:$true] %s142_s18  ;;  %s145_s21 = int_to_ptr.hbm [resolvable:$true] %s144_s21 }
   0xb   :  { %161 = vmatpush.msra.mxu2 %v94_v8  ;;  %v33_v12 = vld [vmem:[%s332_s1 + $0x8] sm:$0xff]  ;;  %v88_v15 = vld [vmem:[%s335_s4 + $0x30] sm:$0xff]  ;;  %v86_v17 = vld [vmem:[%s335_s4 + $0x20] sm:$0xff]  ;;  %31 = vst.msk [vmem:[#allocation2 + $0x8] sm:$0xff] %vm29_vm0, %v206_v22  ;;  %s209_s22 = smov 8  }
   0xc   :  { %102 = vmatpush.msra.mxu1 %v93_v9  ;;  %v87_v16 = vld [vmem:[%s335_s4 + $0x28] sm:$0xff]  ;;  %v85_v18 = vld [vmem:[%s335_s4 + $0x18] sm:$0xff]  ;;  %v84_v19 = vld [vmem:[%s335_s4 + $0x10] sm:$0xff] }
   0xd   :  { %162 = vmatpush.msra.mxu2 %v93_v9  ;;  %v83_v20 = vld [vmem:[%s335_s4 + $0x8] sm:$0xff]  ;;  %v82_v21 = vld [vmem:[%s335_s4] sm:$0xff] }
   0xe   :  { %103 = vmatpush.msra.mxu1 %v92_v10  ;;  %v178_v23 = vld [vmem:[%s334_s3] ss:$0 sm:$0xff] }
   0xf   :  { %163 = vmatpush.msra.mxu2 %v92_v10  ;;  %v179_v36 = vld [vmem:[%s336_s5] ss:$0 sm:$0xff]  ;;  %s208_s5 = smov 128  }
  0x10   :  { %104 = vmatpush.msra.mxu1 %v91_v11 }
  0x11   :  { %157 = vmatmul.msk.f32.gmra.mxu0 %vm29_vm0, %v33_v12  ;;  %164 = vmatpush.msra.mxu2 %v91_v11  ;;  %v80_v33 = vld [vmem:[#allocation2] sm:$0xff] }
  0x12   :  { %105 = vmatpush.msra.mxu1 %v90_v13  ;;  %v81_v39 = vld [vmem:[#allocation2 + $0x8] sm:$0xff] }
  0x13   :  { %165 = vmatpush.msra.mxu2 %v90_v13 }
  0x14   :  { %106 = vmatpush.msra.mxu1 %v89_v14 }
  0x15   :  { %166 = vmatpush.msra.mxu2 %v89_v14 }
  0x16   :  { %107 = vmatpush.msra.mxu1 %v88_v15 }
  0x17   :  { %167 = vmatpush.msra.mxu2 %v88_v15 }
  0x18   :  { %108 = vmatpush.msra.mxu1 %v87_v16 }
  0x19   :  { %168 = vmatpush.msra.mxu2 %v87_v16 }
  0x1a   :  { %109 = vmatpush.msra.mxu1 %v86_v17 }
  0x1b   :  { %169 = vmatpush.msra.mxu2 %v86_v17 }
  0x1c   :  { %110 = vmatpush.msra.mxu1 %v85_v18 }
  0x1d   :  { %170 = vmatpush.msra.mxu2 %v85_v18 }
  0x1e   :  { %111 = vmatpush.msra.mxu1 %v84_v19 }
  0x1f   :  { %171 = vmatpush.msra.mxu2 %v84_v19 }
  0x20   :  { %112 = vmatpush.msra.mxu1 %v83_v20 }
  0x21   :  { %172 = vmatpush.msra.mxu2 %v83_v20 }
  0x22   :  { %113 = vmatpush.msra.mxu1 %v82_v21 }
  0x23   :  { %173 = vmatpush.msra.mxu2 %v82_v21 }
  0x86   :  { %v66_v24 = vpop.f32.mrf.mxu0 }
  0x87   :  { %v67_v26 = vadd.f32 %v178_v23, %v66_v24 }
  0x89   :  { %vm73_vm1 = vcmp.gt.f32.partialorder %v67_v26, 0.0  ;;  %v76_v27 = vmul.f32 %v75_v25, %v67_v26 }
  0x8b   :  { %v78_v28 = vsel %vm73_vm1, %v67_v26, %v76_v27 }
  0x8c   :  { %114 = vmatmul.f32.vlgmr.msra.gmra.mxu1 %v78_v28 }
  0x8e   :  { %v69_v29 = vpop.f32.mrf.mxu0 }
  0x8f   :  { %v70_v30 = vadd.f32 %v178_v23, %v69_v29 }
  0x91   :  { %vm74_vm2 = vcmp.gt.f32.partialorder %v70_v30, 0.0  ;;  %v77_v31 = vmul.f32 %v75_v25, %v70_v30 }
  0x93   :  { %v79_v32 = vsel %vm74_vm2, %v70_v30, %v77_v31 }
  0x94   :  { %117 = vmatmul.f32.vlgmr.msra.gmra.mxu2 %v79_v32 }
 0x109   :  { %v115_v34 = vpop.f32.mrf.mxu1 }
 0x10a   :  { %v121_v35 = vadd.f32 %v115_v34, %v80_v33 }
 0x10c   :  { %123 = vst.msk [vmem:[#allocation2] sm:$0xff] %vm29_vm0, %v121_v35 }
 0x113   :  { %v128_v37 = vld [vmem:[#allocation2] sm:$0xff] }
 0x114   :  { %v134_v38 = vadd.f32 %v179_v36, %v128_v37 }
 0x116   :  { %136 = vst.msk [vmem:[#allocation4] sm:$0xff] %vm29_vm0, %v134_v38 }
 0x117   :  { %v118_v40 = vpop.f32.mrf.mxu2 }
 0x118   :  { %v122_v41 = vadd.f32 %v118_v40, %v81_v39 }
 0x11a   :  { %124 = vst.msk [vmem:[#allocation2 + $0x8] sm:$0xff] %vm29_vm0, %v122_v41 }
 0x121   :  { %v129_v42 = vld [vmem:[#allocation2 + $0x8] sm:$0xff] }
 0x122   :  { %v135_v43 = vadd.f32 %v179_v36, %v129_v42 }
 0x124   :  { %137 = vst.msk [vmem:[#allocation4 + $0x8] sm:$0xff] %vm29_vm0, %v135_v43 }
 0x125   :  { %150 = dma.vmem_to_hbm [thread:$0]  %s143_s18, 256, %s145_s21, [#allocation5], %s208_s5, %s208_s5, %s209_s22  }
 0x126   :  { %204 = dma.done.wait [#allocation5], 256  }
 0x127   :  { %205 = vsyncadd [#allocation5], 4294967040 }
 0x128   :  { %155 = vsyncpa [#allocation5], 1 }

</bundles_post_ra>
